<compile_context>
chip_gen: v6e
topology: v6e:2x2x1
jax: 0.10.0
libtpu: 0.0.40
codegen_flags: <defaults>
</compile_context>

<pallas_src>
import functools
import math

import jax
import jax.numpy as jnp
from jax import lax
from jax.experimental import pallas as pl
from jax.experimental.pallas import tpu as pltpu

_LANE = 128
_SUBLANE = 8


def _round_up(a, b):
    return ((a + b - 1) // b) * b


def _label_smoothing_kernel(x_ref, tgt_ref, out_ref, acc_ref, *,
                            v_total, padding_idx, confidence, smooth_val,
                            log_confidence, log_smooth, mask_cols, check_positive):
    j = pl.program_id(1)

    @pl.when(j == 0)
    def _():
        acc_ref[...] = jnp.zeros_like(acc_ref)

    tm, vt = x_ref.shape
    n_chunks = vt // _LANE

    tgt = tgt_ref[...]                                        # (tm, 1) int32
    # Hoist the lane broadcasts out of the chunk loop.
    tgt_b = jnp.broadcast_to(tgt, (tm, _LANE))
    row_ok = jnp.broadcast_to(tgt != padding_idx, (tm, _LANE))
    base_col = lax.broadcasted_iota(jnp.int32, (tm, _LANE), 1)
    col0 = j * vt                                             # global column offset of tile

    conf = jnp.float32(confidence)
    smth = jnp.float32(smooth_val)
    log_c = jnp.float32(log_confidence)
    log_s = jnp.float32(log_smooth)

    # Process the tile in 128-lane chunks: keeps VMEM temporaries to (tm,128)
    # and performs the lane-direction fold with plain vector adds.
    part = None
    for c in range(n_chunks):
        xc = x_ref[:, c * _LANE:(c + 1) * _LANE].astype(jnp.float32)   # (tm, 128)
        col = base_col + (col0 + c * _LANE)
        is_tgt = col == tgt_b
        keep = jnp.logical_and(col != padding_idx, row_ok)
        if mask_cols:                                # static: only when V was padded
            keep = jnp.logical_and(keep, col < v_total)
        td = jnp.where(is_tgt, conf, smth)
        log_td = jnp.where(is_tgt, log_c, log_s)     # constant-folded log(true_dist)
        if check_positive:                           # static: only for degenerate smoothing
            keep = jnp.logical_and(keep, td > 0.0)
        contrib = jnp.where(keep, td * (log_td - xc), 0.0)
        part = contrib if part is None else part + contrib

    # Sublane fold (tm,128) -> (8,128): cross-vreg VPU adds.
    blk = part[0:_SUBLANE, :]
    for r in range(1, tm // _SUBLANE):
        blk = blk + part[r * _SUBLANE:(r + 1) * _SUBLANE, :]

    acc_ref[...] += blk

    @pl.when(j == pl.num_programs(1) - 1)
    def _():
        out_ref[0] = acc_ref[...]


def label_smoothing_loss(x, target, *, size, padding_idx, smoothing,
                         v_tile_max=2048, tile_bytes=4 * 1024 * 1024,
                         max_block_rows=512):
    """x: (N, V) log-probabilities (f32 or bf16); target: (N,) int labels. Returns scalar loss."""
    n, v = x.shape
    assert v == size
    confidence = 1.0 - float(smoothing)
    smooth_val = float(smoothing) / (size - 2)
    log_confidence = math.log(confidence) if confidence > 0.0 else 0.0
    log_smooth = math.log(smooth_val) if smooth_val > 0.0 else 0.0

    # ---- vocab (lane) tiling: lane axis dense and 128-aligned ----
    if v <= v_tile_max:
        vt = _round_up(v, _LANE)
        v_pad = vt
    else:
        vt = v_tile_max
        v_pad = _round_up(v, vt)
    if v_pad != v:
        # TODO(synk): for very large non-128-aligned vocabs this pad is an extra HBM
        # copy of x; pre-pad the vocab upstream to avoid it.
        x = jnp.pad(x, ((0, 0), (0, v_pad - v)))
    num_vb = v_pad // vt

    # ---- row (sublane) tiling: target ~tile_bytes per x block (fits default
    # scoped VMEM double-buffered on v5e/v6e/v7x without raising vmem limits) ----
    itemsize = jnp.dtype(x.dtype).itemsize
    tm = min(max_block_rows,
             max(_SUBLANE, (tile_bytes // (vt * itemsize)) // _SUBLANE * _SUBLANE))
    if tm >= n:
        tm = _round_up(n, _SUBLANE)
    num_rb = pl.cdiv(n, tm)

    # Pad targets so out-of-range rows carry padding_idx -> masked in the kernel
    # (garbage x rows from the ragged last block contribute exactly 0).
    target2d = target.astype(jnp.int32).reshape(n, 1)
    n_rows = num_rb * tm
    if n_rows != n:
        target2d = jnp.pad(target2d, ((0, n_rows - n), (0, 0)),
                           constant_values=padding_idx)

    kernel = functools.partial(
        _label_smoothing_kernel,
        v_total=v,
        padding_idx=int(padding_idx),
        confidence=confidence,
        smooth_val=smooth_val,
        log_confidence=log_confidence,
        log_smooth=log_smooth,
        mask_cols=(v_pad != v),
        check_positive=(smooth_val <= 0.0 or confidence <= 0.0),
    )

    partials = pl.pallas_call(
        kernel,
        out_shape=jax.ShapeDtypeStruct((num_rb, _SUBLANE, _LANE), jnp.float32),
        grid_spec=pltpu.PrefetchScalarGridSpec(
            num_scalar_prefetch=0,
            grid=(num_rb, num_vb),
            in_specs=[
                pl.BlockSpec((tm, vt), lambda i, j: (i, j)),
                pl.BlockSpec((tm, 1), lambda i, j: (i, 0)),
            ],
            out_specs=pl.BlockSpec((1, _SUBLANE, _LANE), lambda i, j: (i, 0, 0)),
            scratch_shapes=[pltpu.VMEM((_SUBLANE, _LANE), jnp.float32)],
        ),
        compiler_params=pltpu.CompilerParams(
            dimension_semantics=("parallel", "arbitrary"),
        ),
    )(x, target2d)
    return jnp.sum(partials)


def _reference_loss(x, target, *, size, padding_idx, smoothing):
    confidence = 1.0 - smoothing
    n, v = x.shape
    td = jnp.full((n, v), smoothing / (size - 2), dtype=jnp.float32)
    td = td.at[jnp.arange(n), target].set(confidence)
    td = td.at[:, padding_idx].set(0.0)
    td = jnp.where((target == padding_idx)[:, None], 0.0, td)
    safe_log = jnp.log(jnp.where(td > 0, td, 1.0))
    return jnp.sum(jnp.where(td > 0, td * (safe_log - x.astype(jnp.float32)), 0.0))


if __name__ == "__main__":
    key = jax.random.PRNGKey(0)
    k1, k2, k3, k4 = jax.random.split(key, 4)

    # --- Case 1: annotated-transformer toy shape (batch=2, seq=8, vocab=11) ---
    SIZE, PADDING_IDX, SMOOTHING = 11, 0, 0.1
    N = 2 * 8
    x1 = jax.nn.log_softmax(jax.random.normal(k1, (N, SIZE), dtype=jnp.float32), axis=-1)
    t1 = jax.random.randint(k2, (N,), 0, SIZE, dtype=jnp.int32)
    t1 = t1.at[3].set(PADDING_IDX).at[10].set(PADDING_IDX)
    loss1 = jax.block_until_ready(
        label_smoothing_loss(x1, t1, size=SIZE, padding_idx=PADDING_IDX, smoothing=SMOOTHING))
    ref1 = _reference_loss(x1, t1, size=SIZE, padding_idx=PADDING_IDX, smoothing=SMOOTHING)
    assert jnp.allclose(loss1, ref1, rtol=1e-4, atol=1e-4), (loss1, ref1)

    # --- Case 2: ragged rows + tiled vocab (multi row-block, multi V-block, masking) ---
    SIZE2, PAD2, SMOOTH2 = 2500, 0, 0.1
    N2 = 1000
    x2 = jax.nn.log_softmax(jax.random.normal(k3, (N2, SIZE2), dtype=jnp.float32), axis=-1)
    t2 = jax.random.randint(k4, (N2,), 0, SIZE2, dtype=jnp.int32)
    t2 = t2.at[0].set(PAD2).at[777].set(PAD2)
    loss2 = jax.block_until_ready(
        label_smoothing_loss(x2, t2, size=SIZE2, padding_idx=PAD2, smoothing=SMOOTH2))
    ref2 = _reference_loss(x2, t2, size=SIZE2, padding_idx=PAD2, smoothing=SMOOTH2)
    assert jnp.allclose(loss2, ref2, rtol=1e-4, atol=1e-4), (loss2, ref2)

    print("KERNEL_OK")
</pallas_src>

<mosaic_0001>
module attributes {stable_mosaic.version = 11 : i64} {
  func.func @_label_smoothing_kernel(%arg0: i32, %arg1: i32, %arg2: memref<16x128xf32, #tpu.memory_space<vmem>>, %arg3: memref<16x1xi32, #tpu.memory_space<vmem>>, %arg4: memref<1x8x128xf32, #tpu.memory_space<vmem>>, %arg5: memref<8x128xf32, #tpu.memory_space<vmem>>) attributes {dimension_semantics = [#tpu.dimension_semantics<parallel>, #tpu.dimension_semantics<arbitrary>], iteration_bounds = array<i64: 1, 1>, scalar_prefetch = 0 : i64, scratch_operands = 1 : i64, tpu.core_type = #tpu.core_type<tc>, window_params = [{transform_indices = @transform_0, window_bounds = array<i64: 16, 128>}, {transform_indices = @transform_1, window_bounds = array<i64: 16, 1>}, {transform_indices = @transform_2, window_bounds = array<i64: 1, 8, 128>}]} {
    %c0_i32 = arith.constant 0 : i32
    %0 = arith.cmpi eq, %arg1, %c0_i32 : i32
    %1 = arith.extui %0 : i1 to i32
    %c0_i32_0 = arith.constant 0 : i32
    %2 = arith.cmpi ne, %1, %c0_i32_0 : i32
    scf.if %2 {
      %cst_17 = arith.constant 0.000000e+00 : f32
      %42 = vector.broadcast %cst_17 : f32 to vector<8x128xf32>
      %c0_18 = arith.constant 0 : index
      %c0_19 = arith.constant 0 : index
      %43 = vector.load %arg5[%c0_18, %c0_19] : memref<8x128xf32, #tpu.memory_space<vmem>>, vector<8x128xf32>
      tpu.vector_store %arg5[%c0_18, %c0_19], %42 {strides = array<i32>} : memref<8x128xf32, #tpu.memory_space<vmem>>, vector<8x128xf32>,
    } else {
    }
    %c0 = arith.constant 0 : index
    %c0_1 = arith.constant 0 : index
    %3 = vector.load %arg3[%c0, %c0_1] : memref<16x1xi32, #tpu.memory_space<vmem>>, vector<16x1xi32>
    %4 = vector.shape_cast %3 : vector<16x1xi32> to vector<16x1xi32>
    %5 = vector.broadcast %4 : vector<16x1xi32> to vector<16x128xi32>
    %c0_i32_2 = arith.constant 0 : i32
    %6 = vector.broadcast %c0_i32_2 : i32 to vector<16x1xi32>
    %7 = arith.cmpi ne, %3, %6 : vector<16x1xi32>
    %8 = vector.shape_cast %7 : vector<16x1xi1> to vector<16x1xi1>
    %9 = vector.broadcast %8 : vector<16x1xi1> to vector<16x128xi1>
    %10 = tpu.iota {dimensions = array<i32: 1>} : vector<16x128xi32>
    %c128_i32 = arith.constant 128 : i32
    %11 = arith.muli %arg1, %c128_i32 : i32
    %c0_3 = arith.constant 0 : index
    %c0_4 = arith.constant 0 : index
    %12 = vector.load %arg2[%c0_3, %c0_4] : memref<16x128xf32, #tpu.memory_space<vmem>>, vector<16x128xf32>
    %c0_i32_5 = arith.constant 0 : i32
    %13 = arith.addi %11, %c0_i32_5 : i32
    %14 = vector.broadcast %13 : i32 to vector<16x128xi32>
    %15 = arith.addi %10, %14 : vector<16x128xi32>
    %16 = arith.cmpi eq, %15, %5 : vector<16x128xi32>
    %c0_i32_6 = arith.constant 0 : i32
    %17 = vector.broadcast %c0_i32_6 : i32 to vector<16x128xi32>
    %18 = arith.cmpi ne, %15, %17 : vector<16x128xi32>
    %19 = arith.andi %18, %9 : vector<16x128xi1>
    %c11_i32 = arith.constant 11 : i32
    %20 = vector.broadcast %c11_i32 : i32 to vector<16x128xi32>
    %21 = arith.cmpi slt, %15, %20 : vector<16x128xi32>
    %22 = arith.andi %19, %21 : vector<16x128xi1>
    %cst = arith.constant 0.899999976 : f32
    %cst_7 = arith.constant 0.0111111114 : f32
    %23 = vector.broadcast %cst : f32 to vector<16x128xf32>
    %24 = vector.broadcast %cst_7 : f32 to vector<16x128xf32>
    %25 = arith.select %16, %23, %24 : vector<16x128xi1>, vector<16x128xf32>
    %cst_8 = arith.constant -0.105360515 : f32
    %cst_9 = arith.constant -4.49980974 : f32
    %26 = vector.broadcast %cst_8 : f32 to vector<16x128xf32>
    %27 = vector.broadcast %cst_9 : f32 to vector<16x128xf32>
    %28 = arith.select %16, %26, %27 : vector<16x128xi1>, vector<16x128xf32>
    %29 = arith.subf %28, %12 : vector<16x128xf32>
    %30 = arith.mulf %25, %29 : vector<16x128xf32>
    %cst_10 = arith.constant 0.000000e+00 : f32
    %31 = vector.broadcast %cst_10 : f32 to vector<16x128xf32>
    %32 = arith.select %22, %30, %31 : vector<16x128xi1>, vector<16x128xf32>
    %33 = vector.extract_strided_slice %32 {offsets = [0, 0], sizes = [8, 128], strides = [1, 1]} : vector<16x128xf32> to vector<8x128xf32>
    %34 = vector.extract_strided_slice %32 {offsets = [8, 0], sizes = [8, 128], strides = [1, 1]} : vector<16x128xf32> to vector<8x128xf32>
    %35 = arith.addf %33, %34 : vector<8x128xf32>
    %c0_11 = arith.constant 0 : index
    %c0_12 = arith.constant 0 : index
    %36 = vector.load %arg5[%c0_11, %c0_12] : memref<8x128xf32, #tpu.memory_space<vmem>>, vector<8x128xf32>
    %37 = arith.addf %36, %35 : vector<8x128xf32>
    %c0_13 = arith.constant 0 : index
    %c0_14 = arith.constant 0 : index
    %38 = vector.load %arg5[%c0_13, %c0_14] : memref<8x128xf32, #tpu.memory_space<vmem>>, vector<8x128xf32>
    tpu.vector_store %arg5[%c0_13, %c0_14], %37 {strides = array<i32>} : memref<8x128xf32, #tpu.memory_space<vmem>>, vector<8x128xf32>,
    %c0_i32_15 = arith.constant 0 : i32
    %39 = arith.cmpi eq, %arg1, %c0_i32_15 : i32
    %40 = arith.extui %39 : i1 to i32
    %c0_i32_16 = arith.constant 0 : i32
    %41 = arith.cmpi ne, %40, %c0_i32_16 : i32
    scf.if %41 {
      %c0_17 = arith.constant 0 : index
      %c0_18 = arith.constant 0 : index
      %42 = vector.load %arg5[%c0_17, %c0_18] : memref<8x128xf32, #tpu.memory_space<vmem>>, vector<8x128xf32>
      %c0_19 = arith.constant 0 : index
      %c0_20 = arith.constant 0 : index
      %c0_21 = arith.constant 0 : index
      %43 = vector.load %arg4[%c0_19, %c0_20, %c0_21] : memref<1x8x128xf32, #tpu.memory_space<vmem>>, vector<1x8x128xf32>
      %44 = vector.shape_cast %43 : vector<1x8x128xf32> to vector<8x128xf32>
      %45 = vector.shape_cast %42 : vector<8x128xf32> to vector<1x8x128xf32>
      tpu.vector_store %arg4[%c0_19, %c0_20, %c0_21], %45 {strides = array<i32>} : memref<1x8x128xf32, #tpu.memory_space<vmem>>, vector<1x8x128xf32>,
    } else {
    }
    return
  }
  func.func @transform_0(%arg0: i32, %arg1: i32) -> (i32, i32) {
    %c0_i32 = arith.constant 0 : i32
    return %arg0, %arg1 : i32, i32
  }
  func.func @transform_1(%arg0: i32, %arg1: i32) -> (i32, i32) {
    %c0_i32 = arith.constant 0 : i32
    %c0_i32_0 = arith.constant 0 : i32
    return %arg0, %c0_i32 : i32, i32
  }
  func.func @transform_2(%arg0: i32, %arg1: i32) -> (i32, i32, i32) {
    %c0_i32 = arith.constant 0 : i32
    %c0_i32_0 = arith.constant 0 : i32
    %c0_i32_1 = arith.constant 0 : i32
    return %arg0, %c0_i32, %c0_i32_0 : i32, i32, i32
  }
}

</mosaic_0001>

<bundles_post_ra>
// kernel: tpu_custom_call.1
= control target key start
LH: loop header
LB: loop body
LE: loop exit
PB: predicated region body
PF: predicated region fallthrough
CT: control target
= control target key end

     0   :  { %v113_v2 = vmov 0   ;;  %s151_s0 = inlined_call_operand.vmem [shape: f32[16,128], index: 0, kind: input, shape index: {}]   ;;  %s152_s1 = inlined_call_operand.vmem [shape: s32[16,1], index: 1, kind: input, shape index: {}]   ;;  %s153_s2 = inlined_call_operand.hbm [shape: f32[1,8,128], index: 2, kind: output, shape index: {}]  }
   0x1   :  { %v17_v0 = vld [vmem:[%s152_s1] sm:$0xff]  ;;  %v18_v1 = vld [vmem:[%s152_s1 + $0x8] sm:$0xff]  ;;  %89 = vset.pattern.permute.xlu0 %v113_v2  ;;  %90 = vset.pattern.permute.xlu1 %v113_v2 }
   0x2   :  { %vm25_vm0 = vcmp.ne.s32.totalorder %v17_v0, 0  ;;  %vm26_vm1 = vcmp.ne.s32.totalorder %v18_v1, 0 }
   0x3   :  { %7 = vsyncpa [#allocation4], 0  ;;  %20 = vperm.xlu0 %89, %v17_v0   ;;  %v27_v3 = vsel %vm25_vm0, 1, %v113_v2  ;;  %v28_v4 = vsel %vm26_vm1, 1, %v113_v2  ;;  %v37_v5 = vlaneseq  ;;  %v40_v7 = vld [vmem:[%s151_s0] sm:$0xff]  ;;  %v41_v13 = vld [vmem:[%s151_s0 + $0x8] sm:$0xff] }
   0x4   :  { %30 = vperm.xlu1 %90, %v27_v3   ;;  %v114_v10 = vmov -4.4998097   ;;  %v115_v16 = vmov 0.011111111   ;;  %s116_s16 = smov [#allocation3]  }
   0x5   :  { %v38_v6 = vand.u32 127, %v37_v5  ;;  %s77_s0 = sshll.u32 %s116_s16, 4  ;;  %s78_s0 = int_to_ptr.vmem [resolvable:$true] %s77_s0 }
   0x6   :  { %s91_s17 = scalar_lea.vmem %s78_s0, 128  ;;  %p96_p1 = scmp.lt.s32.totalorder %s78_s0, %s78_s0 }
   0x7   :  { %23 = vperm.xlu0 %89, %v18_v1   ;;  %vm46_vm3 = vcmp.ne.s32.totalorder %v38_v6, 0  ;;  %vm49_vm5 = vcmp.lt.s32.totalorder %v38_v6, 11  ;;  %p92_p0 = scmp.ne.s32.totalorder %s78_s0, %s91_s17  ;;  %p97_p2 = scmp.lt.s32.totalorder %s91_s17, %s91_s17 }
   0x8   :  { %33 = vperm.xlu1 %90, %v28_v4  }
   0x9   :  { %p98_p3 = por %p97_p2, %p96_p1 }
   0xb   :  { %p99_p4 = pnand %p98_p3, %p92_p0 }
  0x7e   :  { %v21_v8 = vpop.permute.xlu0 %20 }
  0x7f   :  { %vm44_vm2 = vcmp.eq.s32.totalorder %v38_v6, %v21_v8  ;;  %v31_v9 = vpop.permute.xlu1 %30 }
  0x80   :  { %v54_v11 = vsel %vm44_vm2, -0.105360515, %v114_v10  ;;  %vm35_vm4 = vcmp.eq.s32.totalorder %v31_v9, 1  ;;  %v52_v17 = vsel %vm44_vm2, 0.9, %v115_v16 }
  0x81   :  { %v56_v12 = vsub.f32 %v54_v11, %v40_v7  ;;  %vm47_vm6 = vmand %vm46_vm3, %vm35_vm4 }
  0x82   :  { %v24_v14 = vpop.permute.xlu0 %23  ;;  %vm50_vm10 = vmand %vm47_vm6, %vm49_vm5 }
  0x83   :  { %vm45_vm7 = vcmp.eq.s32.totalorder %v38_v6, %v24_v14  ;;  %v34_v15 = vpop.permute.xlu1 %33  ;;  %v58_v19 = vmul.f32 %v56_v12, %v52_v17 }
  0x84   :  { %v55_v18 = vsel %vm45_vm7, -0.105360515, %v114_v10  ;;  %vm36_vm8 = vcmp.eq.s32.totalorder %v34_v15, 1  ;;  %v53_v21 = vsel %vm45_vm7, 0.9, %v115_v16 }
  0x85   :  { %v57_v20 = vsub.f32 %v55_v18, %v41_v13  ;;  %vm48_vm9 = vmand %vm46_vm3, %vm36_vm8  ;;  %v60_v24 = vsel %vm50_vm10, %v58_v19, 0.0 }
  0x86   :  { %vm51_vm11 = vmand %vm48_vm9, %vm49_vm5 }
  0x87   :  { %v59_v22 = vmul.f32 %v57_v20, %v53_v21 }
  0x89   :  { %v61_v23 = vsel %vm51_vm11, %v59_v22, 0.0 }
  0x8a   :  { %v62_v25 = vadd.f32 %v61_v23, %v60_v24 }
  0x8c   :  { %70 = vst [vmem:[#allocation3] sm:$0xff] %v62_v25 }
  0x8d   :  { %102 = shalt.err (!%p99_p4)
}
  0x8e   :  { %80 = dma.vmem_to_hbm [thread:$0]  %s78_s0, 128, %s153_s2, [#allocation4]  }
  0x8f   :  { %111 = dma.done.wait [#allocation4], 128  }
  0x90   :  { %112 = vsyncadd [#allocation4], 4294967168 }
  0x91   :  { %84 = vsyncpa [#allocation4], 1 }

</bundles_post_ra>
